<compile_context>
chip_gen: v7x
topology: tpu7x:2x2x1
jax: 0.10.0
libtpu: 0.0.40
codegen_flags: <defaults>
</compile_context>

<pallas_src>
import functools

import jax
import jax.numpy as jnp
from jax.experimental import pallas as pl
from jax.experimental.pallas import tpu as pltpu

# Set to jnp.bfloat16 on v6e/v7x for ~2x MXU throughput + half the VMEM/HBM
# traffic (keep f32 accumulation / epilogue).  Default f32 so the strict
# correctness check against the f32 reference holds on all generations.
MATMUL_DTYPE = jnp.float32


def _col_tile(hw, cap=8192):
    """Largest spatial (lane) tile: whole image if it fits, else a 128-multiple divisor."""
    if hw <= cap:
        return hw
    t = (cap // 128) * 128
    while t >= 128:
        if hw % t == 0:
            return t
        t -= 128
    return hw


# ----------------------------------------------------------------------------
# Kernel 1: 1x1 conv (BN folded into weights) + bias + SiLU, plus SE pooled-sum
#           side output accumulated across spatial tiles.
# ----------------------------------------------------------------------------
def _pw_conv_silu_pool_kernel(x_ref, w_ref, b_ref, h_ref, pool_ref):
    # x_ref: (1, Cin, tc)   w_ref: (hidden, Cin)   b_ref: (hidden, 1)
    # h_ref: (1, hidden, tc)   pool_ref: (1, hidden, 1)  [accumulated over tiles]
    x = x_ref[0]
    acc = jnp.dot(w_ref[...].astype(MATMUL_DTYPE), x.astype(MATMUL_DTYPE),
                  preferred_element_type=jnp.float32)          # (hidden, tc)
    y = acc + b_ref[...]                                       # folded-BN bias
    y = y * jax.nn.sigmoid(y)                                  # SiLU
    h_ref[0] = y.astype(h_ref.dtype)

    @pl.when(pl.program_id(1) == 0)
    def _():
        pool_ref[...] = jnp.zeros_like(pool_ref)

    pool_ref[...] += jnp.sum(y, axis=1, keepdims=True)[None]   # SE global-sum


def pw_conv_silu_pool(x3, w1f, b1):
    # x3: (B, Cin, HW)   w1f: (hidden, Cin) scale-folded   b1: (hidden, 1)
    B, Cin, HW = x3.shape
    hidden = w1f.shape[0]
    tc = _col_tile(HW)
    nc = HW // tc
    return pl.pallas_call(
        _pw_conv_silu_pool_kernel,
        out_shape=(jax.ShapeDtypeStruct((B, hidden, HW), x3.dtype),
                   jax.ShapeDtypeStruct((B, hidden, 1), jnp.float32)),
        grid_spec=pltpu.PrefetchScalarGridSpec(
            num_scalar_prefetch=0,
            grid=(B, nc),
            in_specs=[
                pl.BlockSpec((1, Cin, tc), lambda b, c: (b, 0, c)),
                pl.BlockSpec((hidden, Cin), lambda b, c: (0, 0)),
                pl.BlockSpec((hidden, 1), lambda b, c: (0, 0)),
            ],
            out_specs=(
                pl.BlockSpec((1, hidden, tc), lambda b, c: (b, 0, c)),
                pl.BlockSpec((1, hidden, 1), lambda b, c: (b, 0, 0)),
            ),
        ),
        compiler_params=pltpu.CompilerParams(
            dimension_semantics=("parallel", "arbitrary")),
    )(x3, w1f, b1)


# ----------------------------------------------------------------------------
# Kernel 2: SE-gate scale + 3x3 conv as one im2col matmul (K = 9*hidden)
#           + folded-BN bias + SiLU (+ residual add).
# ----------------------------------------------------------------------------
def _conv3_silu_add_kernel(h_ref, g_ref, w_ref, b_ref, *rest, H, W, use_add):
    # h_ref: (1, hidden, HW)   g_ref: (1, hidden, 1)
    # w_ref: (Cout, 9*hidden)  b_ref: (Cout, 1)
    # rest = (res_ref, o_ref) if use_add else (o_ref,)
    if use_add:
        res_ref, o_ref = rest
    else:
        (o_ref,) = rest
    HW = H * W

    h = h_ref[0].astype(jnp.float32) * g_ref[0]            # SE gate (hidden, HW)

    lane = jax.lax.broadcasted_iota(jnp.int32, (1, HW), 1)  # flattened y*W + x
    col = lane % W

    parts = []
    for dy in (-1, 0, 1):
        for dx in (-1, 0, 1):
            s = dy * W + dx                                 # flat shift of this tap
            t = pltpu.roll(h, (-s) % HW, axis=1) if s != 0 else h
            cond = None
            if dy == -1:
                cond = lane >= W
            elif dy == 1:
                cond = lane < (H - 1) * W
            if dx == -1:
                c2 = col >= 1
                cond = c2 if cond is None else jnp.logical_and(cond, c2)
            elif dx == 1:
                c2 = col < (W - 1)
                cond = c2 if cond is None else jnp.logical_and(cond, c2)
            if cond is not None:                            # zero-padding mask
                t = jnp.where(cond, t, 0.0)
            parts.append(t)
    patches = jnp.concatenate(parts, axis=0)                # (9*hidden, HW)

    acc = jnp.dot(w_ref[...].astype(MATMUL_DTYPE), patches.astype(MATMUL_DTYPE),
                  preferred_element_type=jnp.float32)       # (Cout, HW)
    y = acc + b_ref[...]
    y = y * jax.nn.sigmoid(y)                               # SiLU
    if use_add:
        y = y + res_ref[0].astype(jnp.float32)
    o_ref[0] = y.astype(o_ref.dtype)


def conv3x3_silu_add(h3, gate3, w2c, b2, res3, *, H, W, use_add):
    # h3: (B, hidden, HW)  gate3: (B, hidden, 1)  w2c: (Cout, 9*hidden)
    B, hidden, HW = h3.shape
    Cout = w2c.shape[0]
    kernel = functools.partial(_conv3_silu_add_kernel, H=H, W=W, use_add=use_add)
    in_specs = [
        pl.BlockSpec((1, hidden, HW), lambda b: (b, 0, 0)),
        pl.BlockSpec((1, hidden, 1), lambda b: (b, 0, 0)),
        pl.BlockSpec((Cout, 9 * hidden), lambda b: (0, 0)),
        pl.BlockSpec((Cout, 1), lambda b: (0, 0)),
    ]
    args = [h3, gate3, w2c, b2]
    if use_add:
        in_specs.append(pl.BlockSpec((1, Cout, HW), lambda b: (b, 0, 0)))
        args.append(res3)
    return pl.pallas_call(
        kernel,
        out_shape=jax.ShapeDtypeStruct((B, Cout, HW), h3.dtype),
        grid_spec=pltpu.PrefetchScalarGridSpec(
            num_scalar_prefetch=0,
            grid=(B,),
            in_specs=in_specs,
            out_specs=pl.BlockSpec((1, Cout, HW), lambda b: (b, 0, 0)),
        ),
        compiler_params=pltpu.CompilerParams(dimension_semantics=("parallel",)),
    )(*args)


# ----------------------------------------------------------------------------
# Parameter construction (deterministic) + BN folding
# ----------------------------------------------------------------------------
def fold_bn(gamma, beta, mean, var, eps=1e-3):      # BatchNorm2d(eps=0.001)
    scale = gamma / jnp.sqrt(var + eps)
    bias = beta - mean * scale
    return scale, bias


def make_params(key, in_channels, out_channels, expansion=0.5, r=16):
    hidden = int(out_channels * expansion)
    ks = jax.random.split(key, 10)
    p = {}
    # conv1: 1x1, PyTorch (hidden, in, 1, 1) -> stored as (in, hidden)
    p["w1"] = (jax.random.normal(ks[0], (in_channels, hidden), jnp.float32)
               * (1.0 / jnp.sqrt(in_channels)))
    g1 = 1.0 + 0.1 * jax.random.normal(ks[1], (hidden,), jnp.float32)
    b1 = 0.1 * jax.random.normal(ks[2], (hidden,), jnp.float32)
    m1 = 0.05 * jax.random.normal(ks[3], (hidden,), jnp.float32)
    v1 = jnp.abs(1.0 + 0.1 * jax.random.normal(ks[4], (hidden,), jnp.float32))
    p["bn1_scale"], p["bn1_bias"] = fold_bn(g1, b1, m1, v1)
    # SE: l1 (hidden//r, hidden), l2 (hidden, hidden//r), bias=False
    mid = hidden // r
    p["se_w1"] = (jax.random.normal(ks[5], (hidden, mid), jnp.float32)
                  * (1.0 / jnp.sqrt(hidden)))
    p["se_w2"] = (jax.random.normal(ks[6], (mid, hidden), jnp.float32)
                  * (1.0 / jnp.sqrt(max(mid, 1))))
    # conv2: 3x3, PyTorch (out, hidden, 3, 3) -> stored HWIO (3, 3, hidden, out)
    p["w2"] = (jax.random.normal(ks[7], (3, 3, hidden, out_channels), jnp.float32)
               * (1.0 / jnp.sqrt(9 * hidden)))
    g2 = 1.0 + 0.1 * jax.random.normal(ks[8], (out_channels,), jnp.float32)
    b2 = 0.1 * jax.random.normal(ks[9], (out_channels,), jnp.float32)
    m2 = jnp.zeros((out_channels,), jnp.float32)
    v2 = jnp.ones((out_channels,), jnp.float32)
    p["bn2_scale"], p["bn2_bias"] = fold_bn(g2, b2, m2, v2)
    return p


# ----------------------------------------------------------------------------
# Bottleneck forward (Pallas) and pure-JAX reference
# ----------------------------------------------------------------------------
def bottleneck_pallas(x_nchw, params, *, use_add):
    B, Cin, H, W = x_nchw.shape
    HW = H * W
    hidden = params["w1"].shape[1]
    Cout = params["w2"].shape[-1]

    # Fold BN scales into the conv weights (wrapper-side, tiny).
    w1f = (params["w1"] * params["bn1_scale"][None, :]).T          # (hidden, Cin)
    b1 = params["bn1_bias"].reshape(hidden, 1)
    w2c = (params["w2"].reshape(9 * hidden, Cout).T
           * params["bn2_scale"][:, None])                         # (Cout, 9*hidden)
    b2 = params["bn2_bias"].reshape(Cout, 1)

    x3 = x_nchw.reshape(B, Cin, HW)                                # channels-first

    # Kernel 1: conv1 + BN + SiLU, with SE pooled-sum side output.
    h3, pool = pw_conv_silu_pool(x3, w1f, b1)

    # SE FCs (tiny: hidden -> hidden//r -> hidden) in plain JAX.
    pooled = pool[:, :, 0] * (1.0 / HW)                            # (B, hidden)
    gate = jax.nn.sigmoid(
        jnp.maximum(pooled @ params["se_w1"], 0.0) @ params["se_w2"])
    gate3 = gate[:, :, None].astype(jnp.float32)                   # (B, hidden, 1)

    # Kernel 2: SE gate * h, 3x3 conv (im2col) + BN + SiLU (+ residual).
    y3 = conv3x3_silu_add(h3, gate3, w2c, b2,
                          x3 if use_add else None,
                          H=H, W=W, use_add=use_add)
    return y3.reshape(B, Cout, H, W)


def bottleneck_ref(x_nchw, params, *, use_add):
    x = jnp.transpose(x_nchw, (0, 2, 3, 1))
    silu = lambda v: v * jax.nn.sigmoid(v)
    h = silu(jnp.einsum("bhwc,cd->bhwd", x, params["w1"])
             * params["bn1_scale"] + params["bn1_bias"])
    pooled = jnp.mean(h, axis=(1, 2))
    g = jax.nn.sigmoid(jnp.maximum(pooled @ params["se_w1"], 0.0)
                       @ params["se_w2"])
    h = h * g[:, None, None, :]
    y = jax.lax.conv_general_dilated(
        h, params["w2"], window_strides=(1, 1), padding="SAME",
        dimension_numbers=("NHWC", "HWIO", "NHWC"))
    y = silu(y * params["bn2_scale"] + params["bn2_bias"])
    if use_add:
        y = y + x
    return jnp.transpose(y, (0, 3, 1, 2))


if __name__ == "__main__":
    key = jax.random.PRNGKey(0)
    k_x, k_p = jax.random.split(key)

    B, C, H, W = 2, 32, 16, 16            # in_channels == out_channels -> use_add
    x = jax.random.normal(k_x, (B, C, H, W), jnp.float32)
    params = make_params(k_p, in_channels=C, out_channels=C)
    use_add = True                        # shortcut and in_channels == out_channels

    fwd = jax.jit(functools.partial(bottleneck_pallas, use_add=use_add))
    out = jax.block_until_ready(fwd(x, params))
    ref = jax.block_until_ready(bottleneck_ref(x, params, use_add=use_add))

    assert out.shape == (B, C, H, W)
    max_err = float(jnp.max(jnp.abs(out - ref)))
    assert jnp.allclose(out, ref, rtol=2e-3, atol=2e-3), max_err
    print("KERNEL_OK")
</pallas_src>

<mosaic_0001>
module attributes {stable_mosaic.version = 11 : i64} {
  func.func @_pw_conv_silu_pool_kernel(%arg0: i32, %arg1: i32, %arg2: memref<1x32x256xf32, #tpu.memory_space<vmem>>, %arg3: memref<16x32xf32, #tpu.memory_space<vmem>>, %arg4: memref<16x1xf32, #tpu.memory_space<vmem>>, %arg5: memref<1x16x256xf32, #tpu.memory_space<vmem>>, %arg6: memref<1x16x1xf32, #tpu.memory_space<vmem>>) attributes {dimension_semantics = [#tpu.dimension_semantics<parallel>, #tpu.dimension_semantics<arbitrary>], iteration_bounds = array<i64: 2, 1>, scalar_prefetch = 0 : i64, scratch_operands = 0 : i64, tpu.core_type = #tpu.core_type<tc>, window_params = [{transform_indices = @transform_0, window_bounds = array<i64: 1, 32, 256>}, {pipeline_mode = #tpu.pipeline_mode<synchronous>, transform_indices = @transform_1, window_bounds = array<i64: 16, 32>}, {pipeline_mode = #tpu.pipeline_mode<synchronous>, transform_indices = @transform_2, window_bounds = array<i64: 16, 1>}, {transform_indices = @transform_3, window_bounds = array<i64: 1, 16, 256>}, {transform_indices = @transform_4, window_bounds = array<i64: 1, 16, 1>}]} {
    %c0 = arith.constant 0 : index
    %c0_0 = arith.constant 0 : index
    %c0_1 = arith.constant 0 : index
    %0 = vector.load %arg2[%c0, %c0_0, %c0_1] : memref<1x32x256xf32, #tpu.memory_space<vmem>>, vector<1x32x256xf32>
    %1 = vector.shape_cast %0 : vector<1x32x256xf32> to vector<32x256xf32>
    %c0_2 = arith.constant 0 : index
    %c0_3 = arith.constant 0 : index
    %2 = vector.load %arg3[%c0_2, %c0_3] : memref<16x32xf32, #tpu.memory_space<vmem>>, vector<16x32xf32>
    %cst = arith.constant dense<0.000000e+00> : vector<16x256xf32>
    %3 = tpu.matmul %2, %1, %cst {dimension_numbers = #tpu.dot_dimension_numbers<[1], [0], [0], [1], [0, 0, 1, 1], [], []>} : vector<16x32xf32>, vector<32x256xf32>, vector<16x256xf32> -> vector<16x256xf32>
    %c0_4 = arith.constant 0 : index
    %c0_5 = arith.constant 0 : index
    %4 = vector.load %arg4[%c0_4, %c0_5] : memref<16x1xf32, #tpu.memory_space<vmem>>, vector<16x1xf32>
    %5 = vector.broadcast %4 : vector<16x1xf32> to vector<16x256xf32>
    %6 = arith.addf %3, %5 : vector<16x256xf32>
    %7 = arith.negf %6 : vector<16x256xf32>
    %8 = math.exp %7 : vector<16x256xf32>
    %cst_6 = arith.constant 1.000000e+00 : f32
    %9 = vector.broadcast %cst_6 : f32 to vector<16x256xf32>
    %10 = arith.addf %9, %8 : vector<16x256xf32>
    %11 = arith.divf %9, %10 : vector<16x256xf32>
    %12 = arith.mulf %6, %11 : vector<16x256xf32>
    %c0_7 = arith.constant 0 : index
    %c0_8 = arith.constant 0 : index
    %c0_9 = arith.constant 0 : index
    %13 = vector.load %arg5[%c0_7, %c0_8, %c0_9] : memref<1x16x256xf32, #tpu.memory_space<vmem>>, vector<1x16x256xf32>
    %14 = vector.shape_cast %13 : vector<1x16x256xf32> to vector<16x256xf32>
    %15 = vector.shape_cast %12 : vector<16x256xf32> to vector<1x16x256xf32>
    tpu.vector_store %arg5[%c0_7, %c0_8, %c0_9], %15 {strides = array<i32>} : memref<1x16x256xf32, #tpu.memory_space<vmem>>, vector<1x16x256xf32>,
    %c0_i32 = arith.constant 0 : i32
    %16 = arith.cmpi eq, %arg1, %c0_i32 : i32
    %17 = arith.extui %16 : i1 to i32
    %c0_i32_10 = arith.constant 0 : i32
    %18 = arith.cmpi ne, %17, %c0_i32_10 : i32
    scf.if %18 {
      %cst_18 = arith.constant 0.000000e+00 : f32
      %25 = vector.broadcast %cst_18 : f32 to vector<1x16x1xf32>
      %c0_19 = arith.constant 0 : index
      %c0_20 = arith.constant 0 : index
      %c0_21 = arith.constant 0 : index
      %26 = vector.load %arg6[%c0_19, %c0_20, %c0_21] : memref<1x16x1xf32, #tpu.memory_space<vmem>>, vector<1x16x1xf32>
      tpu.vector_store %arg6[%c0_19, %c0_20, %c0_21], %25 {strides = array<i32>} : memref<1x16x1xf32, #tpu.memory_space<vmem>>, vector<1x16x1xf32>,
    } else {
    }
    %c0_11 = arith.constant 0 : index
    %c0_12 = arith.constant 0 : index
    %c0_13 = arith.constant 0 : index
    %19 = vector.load %arg6[%c0_11, %c0_12, %c0_13] : memref<1x16x1xf32, #tpu.memory_space<vmem>>, vector<1x16x1xf32>
    %cst_14 = arith.constant dense<0.000000e+00> : vector<16xf32>
    %20 = vector.multi_reduction <add>, %12, %cst_14 [1] : vector<16x256xf32> to vector<16xf32>
    %21 = vector.shape_cast %20 : vector<16xf32> to vector<16x1xf32>
    %22 = vector.shape_cast %21 : vector<16x1xf32> to vector<1x16x1xf32>
    %23 = arith.addf %19, %22 : vector<1x16x1xf32>
    %c0_15 = arith.constant 0 : index
    %c0_16 = arith.constant 0 : index
    %c0_17 = arith.constant 0 : index
    %24 = vector.load %arg6[%c0_15, %c0_16, %c0_17] : memref<1x16x1xf32, #tpu.memory_space<vmem>>, vector<1x16x1xf32>
    tpu.vector_store %arg6[%c0_15, %c0_16, %c0_17], %23 {strides = array<i32>} : memref<1x16x1xf32, #tpu.memory_space<vmem>>, vector<1x16x1xf32>,
    return
  }
  func.func @transform_0(%arg0: i32, %arg1: i32) -> (i32, i32, i32) {
    %c0_i32 = arith.constant 0 : i32
    %c0_i32_0 = arith.constant 0 : i32
    return %arg0, %c0_i32, %arg1 : i32, i32, i32
  }
  func.func @transform_1(%arg0: i32, %arg1: i32) -> (i32, i32) {
    %c0_i32 = arith.constant 0 : i32
    %c0_i32_0 = arith.constant 0 : i32
    %c0_i32_1 = arith.constant 0 : i32
    return %c0_i32, %c0_i32_0 : i32, i32
  }
  func.func @transform_2(%arg0: i32, %arg1: i32) -> (i32, i32) {
    %c0_i32 = arith.constant 0 : i32
    %c0_i32_0 = arith.constant 0 : i32
    %c0_i32_1 = arith.constant 0 : i32
    return %c0_i32, %c0_i32_0 : i32, i32
  }
  func.func @transform_3(%arg0: i32, %arg1: i32) -> (i32, i32, i32) {
    %c0_i32 = arith.constant 0 : i32
    %c0_i32_0 = arith.constant 0 : i32
    return %arg0, %c0_i32, %arg1 : i32, i32, i32
  }
  func.func @transform_4(%arg0: i32, %arg1: i32) -> (i32, i32, i32) {
    %c0_i32 = arith.constant 0 : i32
    %c0_i32_0 = arith.constant 0 : i32
    %c0_i32_1 = arith.constant 0 : i32
    return %arg0, %c0_i32, %c0_i32_0 : i32, i32, i32
  }
}

module attributes {stable_mosaic.version = 11 : i64} {
  func.func @_conv3_silu_add_kernel(%arg0: i32, %arg1: memref<1x16x256xf32, #tpu.memory_space<vmem>>, %arg2: memref<1x16x1xf32, #tpu.memory_space<vmem>>, %arg3: memref<32x144xf32, #tpu.memory_space<vmem>>, %arg4: memref<32x1xf32, #tpu.memory_space<vmem>>, %arg5: memref<1x32x256xf32, #tpu.memory_space<vmem>>, %arg6: memref<1x32x256xf32, #tpu.memory_space<vmem>>) attributes {dimension_semantics = [#tpu.dimension_semantics<parallel>], iteration_bounds = array<i64: 2>, scalar_prefetch = 0 : i64, scratch_operands = 0 : i64, tpu.core_type = #tpu.core_type<tc>, window_params = [{transform_indices = @transform_0, window_bounds = array<i64: 1, 16, 256>}, {transform_indices = @transform_1, window_bounds = array<i64: 1, 16, 1>}, {pipeline_mode = #tpu.pipeline_mode<synchronous>, transform_indices = @transform_2, window_bounds = array<i64: 32, 144>}, {pipeline_mode = #tpu.pipeline_mode<synchronous>, transform_indices = @transform_3, window_bounds = array<i64: 32, 1>}, {transform_indices = @transform_4, window_bounds = array<i64: 1, 32, 256>}, {transform_indices = @transform_5, window_bounds = array<i64: 1, 32, 256>}]} {
    %c0 = arith.constant 0 : index
    %c0_0 = arith.constant 0 : index
    %c0_1 = arith.constant 0 : index
    %0 = vector.load %arg1[%c0, %c0_0, %c0_1] : memref<1x16x256xf32, #tpu.memory_space<vmem>>, vector<1x16x256xf32>
    %1 = vector.shape_cast %0 : vector<1x16x256xf32> to vector<16x256xf32>
    %c0_2 = arith.constant 0 : index
    %c0_3 = arith.constant 0 : index
    %c0_4 = arith.constant 0 : index
    %2 = vector.load %arg2[%c0_2, %c0_3, %c0_4] : memref<1x16x1xf32, #tpu.memory_space<vmem>>, vector<1x16x1xf32>
    %3 = vector.shape_cast %2 : vector<1x16x1xf32> to vector<16x1xf32>
    %4 = vector.broadcast %3 : vector<16x1xf32> to vector<16x256xf32>
    %5 = arith.mulf %1, %4 : vector<16x256xf32>
    %6 = tpu.iota {dimensions = array<i32: 1>} : vector<1x256xi32>
    %c16_i32 = arith.constant 16 : i32
    %c0_i32 = arith.constant 0 : i32
    %7 = arith.cmpi eq, %c16_i32, %c0_i32 : i32
    %c1_i32 = arith.constant 1 : i32
    %8 = arith.select %7, %c1_i32, %c16_i32 : i32
    %9 = vector.broadcast %8 : i32 to vector<1x256xi32>
    %10 = arith.remsi %6, %9 : vector<1x256xi32>
    %c0_i32_5 = arith.constant 0 : i32
    %11 = vector.broadcast %c0_i32_5 : i32 to vector<1x256xi32>
    %12 = arith.cmpi ne, %10, %11 : vector<1x256xi32>
    %c0_i32_6 = arith.constant 0 : i32
    %13 = vector.broadcast %c0_i32_6 : i32 to vector<1x256xi32>
    %14 = arith.cmpi slt, %10, %13 : vector<1x256xi32>
    %c0_i32_7 = arith.constant 0 : i32
    %15 = arith.cmpi slt, %8, %c0_i32_7 : i32
    %16 = vector.broadcast %15 : i1 to vector<1x256xi1>
    %17 = vector.broadcast %16 : vector<1x256xi1> to vector<1x256xi1>
    %18 = arith.xori %14, %17 : vector<1x256xi1>
    %19 = arith.andi %18, %12 : vector<1x256xi1>
    %20 = vector.broadcast %8 : i32 to vector<1x256xi32>
    %21 = arith.addi %10, %20 : vector<1x256xi32>
    %22 = arith.select %19, %21, %10 : vector<1x256xi1>, vector<1x256xi32>
    %c17_i32 = arith.constant 17 : i32
    %23 = tpu.dynamic_rotate %5 by %c17_i32 dim 1 : vector<16x256xf32>, i32 -> vector<16x256xf32>
    %c16_i32_8 = arith.constant 16 : i32
    %24 = vector.broadcast %c16_i32_8 : i32 to vector<1x256xi32>
    %25 = arith.cmpi sge, %6, %24 : vector<1x256xi32>
    %c1_i32_9 = arith.constant 1 : i32
    %26 = vector.broadcast %c1_i32_9 : i32 to vector<1x256xi32>
    %27 = arith.cmpi sge, %22, %26 : vector<1x256xi32>
    %28 = arith.andi %25, %27 : vector<1x256xi1>
    %cst = arith.constant 0.000000e+00 : f32
    %29 = vector.shape_cast %28 : vector<1x256xi1> to vector<1x256xi1>
    %30 = vector.broadcast %29 : vector<1x256xi1> to vector<16x256xi1>
    %31 = vector.broadcast %cst : f32 to vector<16x256xf32>
    %32 = arith.select %30, %23, %31 : vector<16x256xi1>, vector<16x256xf32>
    %c16_i32_10 = arith.constant 16 : i32
    %33 = tpu.dynamic_rotate %5 by %c16_i32_10 dim 1 : vector<16x256xf32>, i32 -> vector<16x256xf32>
    %c16_i32_11 = arith.constant 16 : i32
    %34 = vector.broadcast %c16_i32_11 : i32 to vector<1x256xi32>
    %35 = arith.cmpi sge, %6, %34 : vector<1x256xi32>
    %cst_12 = arith.constant 0.000000e+00 : f32
    %36 = vector.shape_cast %35 : vector<1x256xi1> to vector<1x256xi1>
    %37 = vector.broadcast %36 : vector<1x256xi1> to vector<16x256xi1>
    %38 = vector.broadcast %cst_12 : f32 to vector<16x256xf32>
    %39 = arith.select %37, %33, %38 : vector<16x256xi1>, vector<16x256xf32>
    %c15_i32 = arith.constant 15 : i32
    %40 = tpu.dynamic_rotate %5 by %c15_i32 dim 1 : vector<16x256xf32>, i32 -> vector<16x256xf32>
    %c16_i32_13 = arith.constant 16 : i32
    %41 = vector.broadcast %c16_i32_13 : i32 to vector<1x256xi32>
    %42 = arith.cmpi sge, %6, %41 : vector<1x256xi32>
    %c15_i32_14 = arith.constant 15 : i32
    %43 = vector.broadcast %c15_i32_14 : i32 to vector<1x256xi32>
    %44 = arith.cmpi slt, %22, %43 : vector<1x256xi32>
    %45 = arith.andi %42, %44 : vector<1x256xi1>
    %cst_15 = arith.constant 0.000000e+00 : f32
    %46 = vector.shape_cast %45 : vector<1x256xi1> to vector<1x256xi1>
    %47 = vector.broadcast %46 : vector<1x256xi1> to vector<16x256xi1>
    %48 = vector.broadcast %cst_15 : f32 to vector<16x256xf32>
    %49 = arith.select %47, %40, %48 : vector<16x256xi1>, vector<16x256xf32>
    %c1_i32_16 = arith.constant 1 : i32
    %50 = tpu.dynamic_rotate %5 by %c1_i32_16 dim 1 : vector<16x256xf32>, i32 -> vector<16x256xf32>
    %c1_i32_17 = arith.constant 1 : i32
    %51 = vector.broadcast %c1_i32_17 : i32 to vector<1x256xi32>
    %52 = arith.cmpi sge, %22, %51 : vector<1x256xi32>
    %cst_18 = arith.constant 0.000000e+00 : f32
    %53 = vector.shape_cast %52 : vector<1x256xi1> to vector<1x256xi1>
    %54 = vector.broadcast %53 : vector<1x256xi1> to vector<16x256xi1>
    %55 = vector.broadcast %cst_18 : f32 to vector<16x256xf32>
    %56 = arith.select %54, %50, %55 : vector<16x256xi1>, vector<16x256xf32>
    %c255_i32 = arith.constant 255 : i32
    %57 = tpu.dynamic_rotate %5 by %c255_i32 dim 1 : vector<16x256xf32>, i32 -> vector<16x256xf32>
    %c15_i32_19 = arith.constant 15 : i32
    %58 = vector.broadcast %c15_i32_19 : i32 to vector<1x256xi32>
    %59 = arith.cmpi slt, %22, %58 : vector<1x256xi32>
    %cst_20 = arith.constant 0.000000e+00 : f32
    %60 = vector.shape_cast %59 : vector<1x256xi1> to vector<1x256xi1>
    %61 = vector.broadcast %60 : vector<1x256xi1> to vector<16x256xi1>
    %62 = vector.broadcast %cst_20 : f32 to vector<16x256xf32>
    %63 = arith.select %61, %57, %62 : vector<16x256xi1>, vector<16x256xf32>
    %c241_i32 = arith.constant 241 : i32
    %64 = tpu.dynamic_rotate %5 by %c241_i32 dim 1 : vector<16x256xf32>, i32 -> vector<16x256xf32>
    %c240_i32 = arith.constant 240 : i32
    %65 = vector.broadcast %c240_i32 : i32 to vector<1x256xi32>
    %66 = arith.cmpi slt, %6, %65 : vector<1x256xi32>
    %c1_i32_21 = arith.constant 1 : i32
    %67 = vector.broadcast %c1_i32_21 : i32 to vector<1x256xi32>
    %68 = arith.cmpi sge, %22, %67 : vector<1x256xi32>
    %69 = arith.andi %66, %68 : vector<1x256xi1>
    %cst_22 = arith.constant 0.000000e+00 : f32
    %70 = vector.shape_cast %69 : vector<1x256xi1> to vector<1x256xi1>
    %71 = vector.broadcast %70 : vector<1x256xi1> to vector<16x256xi1>
    %72 = vector.broadcast %cst_22 : f32 to vector<16x256xf32>
    %73 = arith.select %71, %64, %72 : vector<16x256xi1>, vector<16x256xf32>
    %c240_i32_23 = arith.constant 240 : i32
    %74 = tpu.dynamic_rotate %5 by %c240_i32_23 dim 1 : vector<16x256xf32>, i32 -> vector<16x256xf32>
    %c240_i32_24 = arith.constant 240 : i32
    %75 = vector.broadcast %c240_i32_24 : i32 to vector<1x256xi32>
    %76 = arith.cmpi slt, %6, %75 : vector<1x256xi32>
    %cst_25 = arith.constant 0.000000e+00 : f32
    %77 = vector.shape_cast %76 : vector<1x256xi1> to vector<1x256xi1>
    %78 = vector.broadcast %77 : vector<1x256xi1> to vector<16x256xi1>
    %79 = vector.broadcast %cst_25 : f32 to vector<16x256xf32>
    %80 = arith.select %78, %74, %79 : vector<16x256xi1>, vector<16x256xf32>
    %c239_i32 = arith.constant 239 : i32
    %81 = tpu.dynamic_rotate %5 by %c239_i32 dim 1 : vector<16x256xf32>, i32 -> vector<16x256xf32>
    %c240_i32_26 = arith.constant 240 : i32
    %82 = vector.broadcast %c240_i32_26 : i32 to vector<1x256xi32>
    %83 = arith.cmpi slt, %6, %82 : vector<1x256xi32>
    %c15_i32_27 = arith.constant 15 : i32
    %84 = vector.broadcast %c15_i32_27 : i32 to vector<1x256xi32>
    %85 = arith.cmpi slt, %22, %84 : vector<1x256xi32>
    %86 = arith.andi %83, %85 : vector<1x256xi1>
    %cst_28 = arith.constant 0.000000e+00 : f32
    %87 = vector.shape_cast %86 : vector<1x256xi1> to vector<1x256xi1>
    %88 = vector.broadcast %87 : vector<1x256xi1> to vector<16x256xi1>
    %89 = vector.broadcast %cst_28 : f32 to vector<16x256xf32>
    %90 = arith.select %88, %81, %89 : vector<16x256xi1>, vector<16x256xf32>
    %91 = tpu.concatenate %32, %39, %49, %56, %5, %63, %73, %80, %90 in 0 : vector<16x256xf32>, vector<16x256xf32>, vector<16x256xf32>, vector<16x256xf32>, vector<16x256xf32>, vector<16x256xf32>, vector<16x256xf32>, vector<16x256xf32>, vector<16x256xf32> -> vector<144x256xf32>
    %c0_29 = arith.constant 0 : index
    %c0_30 = arith.constant 0 : index
    %92 = vector.load %arg3[%c0_29, %c0_30] : memref<32x144xf32, #tpu.memory_space<vmem>>, vector<32x144xf32>
    %cst_31 = arith.constant dense<0.000000e+00> : vector<32x256xf32>
    %93 = tpu.matmul %92, %91, %cst_31 {dimension_numbers = #tpu.dot_dimension_numbers<[1], [0], [0], [1], [0, 0, 1, 1], [], []>} : vector<32x144xf32>, vector<144x256xf32>, vector<32x256xf32> -> vector<32x256xf32>
    %c0_32 = arith.constant 0 : index
    %c0_33 = arith.constant 0 : index
    %94 = vector.load %arg4[%c0_32, %c0_33] : memref<32x1xf32, #tpu.memory_space<vmem>>, vector<32x1xf32>
    %95 = vector.broadcast %94 : vector<32x1xf32> to vector<32x256xf32>
    %96 = arith.addf %93, %95 : vector<32x256xf32>
    %97 = arith.negf %96 : vector<32x256xf32>
    %98 = math.exp %97 : vector<32x256xf32>
    %cst_34 = arith.constant 1.000000e+00 : f32
    %99 = vector.broadcast %cst_34 : f32 to vector<32x256xf32>
    %100 = arith.addf %99, %98 : vector<32x256xf32>
    %101 = arith.divf %99, %100 : vector<32x256xf32>
    %102 = arith.mulf %96, %101 : vector<32x256xf32>
    %c0_35 = arith.constant 0 : index
    %c0_36 = arith.constant 0 : index
    %c0_37 = arith.constant 0 : index
    %103 = vector.load %arg5[%c0_35, %c0_36, %c0_37] : memref<1x32x256xf32, #tpu.memory_space<vmem>>, vector<1x32x256xf32>
    %104 = vector.shape_cast %103 : vector<1x32x256xf32> to vector<32x256xf32>
    %105 = arith.addf %102, %104 : vector<32x256xf32>
    %c0_38 = arith.constant 0 : index
    %c0_39 = arith.constant 0 : index
    %c0_40 = arith.constant 0 : index
    %106 = vector.load %arg6[%c0_38, %c0_39, %c0_40] : memref<1x32x256xf32, #tpu.memory_space<vmem>>, vector<1x32x256xf32>
    %107 = vector.shape_cast %106 : vector<1x32x256xf32> to vector<32x256xf32>
    %108 = vector.shape_cast %105 : vector<32x256xf32> to vector<1x32x256xf32>
    tpu.vector_store %arg6[%c0_38, %c0_39, %c0_40], %108 {strides = array<i32>} : memref<1x32x256xf32, #tpu.memory_space<vmem>>, vector<1x32x256xf32>,
    return
  }
  func.func @transform_0(%arg0: i32) -> (i32, i32, i32) {
    %c0_i32 = arith.constant 0 : i32
    %c0_i32_0 = arith.constant 0 : i32
    %c0_i32_1 = arith.constant 0 : i32
    return %arg0, %c0_i32, %c0_i32_0 : i32, i32, i32
  }
  func.func @transform_1(%arg0: i32) -> (i32, i32, i32) {
    %c0_i32 = arith.constant 0 : i32
    %c0_i32_0 = arith.constant 0 : i32
    %c0_i32_1 = arith.constant 0 : i32
    return %arg0, %c0_i32, %c0_i32_0 : i32, i32, i32
  }
  func.func @transform_2(%arg0: i32) -> (i32, i32) {
    %c0_i32 = arith.constant 0 : i32
    %c0_i32_0 = arith.constant 0 : i32
    %c0_i32_1 = arith.constant 0 : i32
    return %c0_i32, %c0_i32_0 : i32, i32
  }
  func.func @transform_3(%arg0: i32) -> (i32, i32) {
    %c0_i32 = arith.constant 0 : i32
    %c0_i32_0 = arith.constant 0 : i32
    %c0_i32_1 = arith.constant 0 : i32
    return %c0_i32, %c0_i32_0 : i32, i32
  }
  func.func @transform_4(%arg0: i32) -> (i32, i32, i32) {
    %c0_i32 = arith.constant 0 : i32
    %c0_i32_0 = arith.constant 0 : i32
    %c0_i32_1 = arith.constant 0 : i32
    return %arg0, %c0_i32, %c0_i32_0 : i32, i32, i32
  }
  func.func @transform_5(%arg0: i32) -> (i32, i32, i32) {
    %c0_i32 = arith.constant 0 : i32
    %c0_i32_0 = arith.constant 0 : i32
    %c0_i32_1 = arith.constant 0 : i32
    return %arg0, %c0_i32, %c0_i32_0 : i32, i32, i32
  }
}

</mosaic_0001>

<bundles_post_ra>
// kernel: bottleneck_pallas.3
= control target key start
LH: loop header
LB: loop body
LE: loop exit
PB: predicated region body
PF: predicated region fallthrough
CT: control target
= control target key end

     0   :  { %s1094_s18 = smov 0   ;;  %s1409_s0 = inlined_call_operand.vmem [shape: f32[2,16,256], index: 0, kind: input, shape index: {}]   ;;  %s1410_s1 = inlined_call_operand.vmem [shape: f32[2,16,1], index: 1, kind: input, shape index: {}]   ;;  %s1411_s2 = inlined_call_operand.vmem [shape: f32[32,144], index: 2, kind: input, shape index: {}]   ;;  %s1412_s3 = inlined_call_operand.vmem [shape: f32[32,1], index: 3, kind: input, shape index: {}]   ;;  %s1413_s4 = inlined_call_operand.vmem [shape: f32[2,32,256], index: 4, kind: input, shape index: {}]   ;;  %s1414_s5 = inlined_call_operand.vmem [shape: f32[2,32,256], index: 5, kind: output, shape index: {}]  }
   0x1 LB: > { %s789_s19 = sadd.s32 4294967295, %s1053_s18   ;;  %p793_p0 = scmp.ge.s32.totalorder %s1053_s18, 1  ;;  %s1053_s18 = sphi %s1094_s18, %s15_s18  }
   0x2   : > { %p207_p1 = scmp.lt.s32.totalorder %s1053_s18, 3 }
   0x4   : > { %p208_p2 = pnand %p793_p0, %p207_p1 }
   0x5   : > { %p245_p3 = scmp.lt.s32.totalorder (!%p208_p2), %s789_s19, 1  ;;  %v1055_v0 = vmov (!%p208_p2), 0   ;;  %s1056_s28 = smov (!%p208_p2), 16   ;;  %v504_v17 = vld [vmem:[%s1412_s3] sm:$0xff] (!%p208_p2)  ;;  %v506_v18 = vld [vmem:[%s1412_s3 + $0x10] sm:$0xff] (!%p208_p2)  ;;  %v497_v19 = vld [vmem:[%s1411_s2 + $0x8] sm:$0xff] (!%p208_p2)  ;;  %v285_v23 = vlaneseq (!%p208_p2) }
   0x6   : > { %211 = sbr.rel (%p208_p2) target bundleno = 566 (0x236), region = 40  ;;  %933 = vset.pattern.permute.xlu0 (!%p208_p2), %v1055_v0  ;;  %1014 = vset.pattern.permute.xlu1 (!%p208_p2), %v1055_v0  ;;  %s1057_s29 = smov (!%p208_p2), 17   ;;  %vm528_vm0 = vcmask (!%p208_p2), 130048   ;;  %v501_v20 = vld [vmem:[%s1411_s2 + $0x28] sm:$0xff] (!%p208_p2)  ;;  %v507_v22 = vld [vmem:[%s1412_s3 + $0x18] sm:$0xff] (!%p208_p2) }
   0x7   : > { %s1058_s30 = smov (!%p208_p2), 15   ;;  %s1059_s6 = smov (!%p208_p2), 1   ;;  %830 = vmatprep.mubr.msk.f32.mxu0 (!%p208_p2), %vm528_vm0, %v497_v19  ;;  %832 = vmatprep.mubr.msk.f32.mxu1 (!%p208_p2), %vm528_vm0, %v501_v20  ;;  %v505_v21 = vld [vmem:[%s1412_s3 + $0x8] sm:$0xff] (!%p208_p2)  ;;  %v1136_v24 = vand.u32 (!%p208_p2), 127, %v285_v23 }
   0x8   : > { %s1060_s7 = smov (!%p208_p2), 127   ;;  %s1061_s8 = smov (!%p208_p2), 113  }
   0x9   : > { %s1062_s9 = smov (!%p208_p2), 112   ;;  %s1063_s10 = smov (!%p208_p2), 111   ;;  %v1139_v25 = vadd.s32 (!%p208_p2), 128, %v1136_v24  ;;  %v292_v26 = vand.u32 (!%p208_p2), 15, %v1136_v24  ;;  %vm325_vm1 = vcmp.ge.s32.totalorder (!%p208_p2), %v1136_v24, 16  ;;  %vm320_vm3 = vcmp.lt.s32.totalorder (!%p208_p2), %v1136_v24, 17 }
   0xa   : > { %vm347_vm7 = vcmp.lt.s32.totalorder (!%p208_p2), %v1136_v24, 16  ;;  %vm368_vm10 = vcmp.lt.s32.totalorder (!%p208_p2), %v1136_v24, 15  ;;  %vm1196_vm12 = vmpackc.low (!%p208_p2), %vm325_vm1, %vm325_vm1  ;;  %vm393_vm15 = vcmp.lt.s32.totalorder (!%p208_p2), %v1136_v24, 1 }
   0xb   : > { %v299_v29 = vand.u32 (!%p208_p2), 15, %v1139_v25  ;;  %vm1144_vm2 = vcmp.ge.s32.totalorder (!%p208_p2), %v292_v26, 1  ;;  %vm1189_vm11 = vcmp.lt.s32.totalorder (!%p208_p2), %v292_v26, 15 }
   0xc   : > { %vm1157_vm5 = vmand (!%p208_p2), %vm325_vm1, %vm1144_vm2 }
   0xd   : > { %s1442_s19 = smov (!%p245_p3, %s789_s19), 1  ;;  %vm1149_vm4 = vcmp.ge.s32.totalorder %v299_v29, 1  ;;  %vm852_vm8 = vmpackc.low %vm1157_vm5, %vm1157_vm5  ;;  %vm1182_vm9 = vcmp.lt.s32.totalorder %v299_v29, 15 }
   0xe   : > { %s845_s20 = sshll.u32 %s1442_s19, 4  ;;  %s844_s24 = sshll.u32 %s1442_s19, 5  ;;  %vm1164_vm6 = vmpackc.low %vm1149_vm4, %vm1149_vm4 }
   0xf   : > { %s254_s23 = scalar_lea.vmem %s1410_s1, %s845_s20  ;;  %s249_s27 = scalar_lea.vmem %s1409_s0, %s844_s24  ;;  %vm1203_vm13 = vmpackc.low %vm1182_vm9, %vm1182_vm9 }
  0x10   : > { %v269_v1 = vld [vmem:[%s254_s23] sm:$0xff]  ;;  %v270_v2 = vld [vmem:[%s254_s23 + $0x8] sm:$0xff]  ;;  %v267_v5 = vld [vmem:[%s249_s27 + $0x10] sm:$0xff]  ;;  %s846_s12 = sshll.u32 %s1442_s19, 6 }
  0x11   : > { %273 = vperm.xlu0 %933, %v269_v1   ;;  %v265_v4 = vld [vmem:[%s249_s27] sm:$0xff]  ;;  %v268_v7 = vld [vmem:[%s249_s27 + $0x18] sm:$0xff]  ;;  %v266_v10 = vld [vmem:[%s249_s27 + $0x8] sm:$0xff]  ;;  %s1376_s15 = scalar_lea.vmem %s1413_s4, %s846_s12  ;;  %s1383_s17 = scalar_lea.vmem %s1414_s5, %s846_s12 }
  0x12   : > { %vm1211_vm14 = vmand %vm325_vm1, %vm1189_vm11 }
  0x13   : > { %vm863_vm1 = vmpackc.low %vm1211_vm14, %vm1211_vm14 }
  0x14   : > { %vm1235_vm5 = vmpackc.low %vm1144_vm2, %vm1144_vm2  ;;  %vm435_vm2 = vcmp.lt.s32.totalorder %v1136_v24, 113 }
  0x15   : > { %278 = vperm.xlu0 %933, %v270_v2  }
  0x90   : > { %v274_v3 = vpop.permute.xlu0 %273 }
  0x91   : > { %v281_v8 = vmul.f32 %v274_v3, %v265_v4  ;;  %v282_v13 = vmul.f32 %v274_v3, %v266_v10 }
  0x94   : > { %v279_v6 = vpop.permute.xlu0 %278 }
  0x95   : > { %v283_v9 = vmul.f32 %v279_v6, %v267_v5  ;;  %v284_v11 = vmul.f32 %v279_v6, %v268_v7 }
  0x97   : > { %v944_v12 = vpack.i.bf16 %v283_v9, %v281_v8  ;;  %v939_v14 = vpack.i.bf16 %v284_v11, %v282_v13  ;;  %v1112_v15 = vpack.c.bf16 %v284_v11, %v282_v13  ;;  %v1114_v16 = vpack.c.bf16 %v283_v9, %v281_v8 }
  0x99   : > { %945 = vrot.lane.b32.xlu0 %v944_v12, %s1056_s28  ;;  %935 = vrot.lane.b32.xlu1 %v944_v12, %s1057_s29 }
  0x9d   : > { %955 = vrot.lane.b32.xlu0 %v944_v12, %s1058_s30  ;;  %940 = vrot.lane.b32.xlu1 %v939_v14, %s1057_s29 }
  0xa1   : > { %965 = vrot.lane.b32.xlu0 %v944_v12, %s1059_s6  ;;  %950 = vrot.lane.b32.xlu1 %v939_v14, %s1056_s28 }
  0xa5   : > { %975 = vrot.lane.b32.xlu0 %v944_v12, %s1060_s7  ;;  %960 = vrot.lane.b32.xlu1 %v939_v14, %s1058_s30 }
  0xa9   : > { %985 = vrot.lane.b32.xlu0 %v944_v12, %s1061_s8  ;;  %970 = vrot.lane.b32.xlu1 %v939_v14, %s1059_s6 }
  0xad   : > { %995 = vrot.lane.b32.xlu0 %v944_v12, %s1062_s9  ;;  %980 = vrot.lane.b32.xlu1 %v939_v14, %s1060_s7 }
  0xb1   : > { %1005 = vrot.lane.b32.xlu0 %v944_v12, %s1063_s10  ;;  %990 = vrot.lane.b32.xlu1 %v939_v14, %s1061_s8 }
  0xb5   : > { %510 = vperm.xlu0 %933, %v504_v17   ;;  %1000 = vrot.lane.b32.xlu1 %v939_v14, %s1062_s9 }
  0xb9   : > { %520 = vperm.xlu0 %933, %v506_v18   ;;  %1010 = vrot.lane.b32.xlu1 %v939_v14, %s1063_s10 }
  0xbd   : > { %515 = vperm.xlu1 %1014, %v505_v21  }
  0xc1   : > { %525 = vperm.xlu1 %1014, %v507_v22  }
 0x10b   : > { %v946_v27 = vpop.permute.xlu0 %945  ;;  %v936_v28 = vpop.permute.xlu1 %935 }
 0x10c   : > { %v938_v34 = vunpack.i.h.bf16 %v936_v28  ;;  %v937_v35 = vunpack.i.l.bf16 %v936_v28  ;;  %v948_v48 = vunpack.i.h.bf16 %v946_v27  ;;  %v947_v49 = vunpack.i.l.bf16 %v946_v27 }
 0x10f   : > { %v956_v31 = vpop.permute.xlu0 %955  ;;  %v941_v32 = vpop.permute.xlu1 %940 }
 0x110   : > { %v943_v36 = vunpack.i.h.bf16 %v941_v32  ;;  %v942_v37 = vunpack.i.l.bf16 %v941_v32  ;;  %v958_v56 = vunpack.i.h.bf16 %v956_v31  ;;  %v957_v60 = vunpack.i.l.bf16 %v956_v31 }
 0x112   : > { %v321_v39 = vsel %vm320_vm3, %v937_v35, %v942_v37  ;;  %v322_v40 = vsel %vm320_vm3, %v938_v34, %v943_v36  ;;  %v323_v42 = vsel %vm320_vm3, %v942_v37, %v937_v35  ;;  %v324_v43 = vsel %vm320_vm3, %v943_v36, %v938_v34 }
 0x113   : > { %v966_v44 = vpop.permute.xlu0 %965  ;;  %v951_v45 = vpop.permute.xlu1 %950  ;;  %v848_v46 = vpack.c.bf16 %v322_v40, %v321_v39  ;;  %v851_v47 = vpack.c.bf16 %v324_v43, %v323_v42  ;;  %vm414_vm3 = vcmp.lt.s32.totalorder %v1136_v24, 127 }
 0x114   : > { %v953_v50 = vunpack.i.h.bf16 %v951_v45  ;;  %v952_v51 = vunpack.i.l.bf16 %v951_v45  ;;  %v968_v9 = vunpack.i.h.bf16 %v966_v44  ;;  %v967_v12 = vunpack.i.l.bf16 %v966_v44 }
 0x115   : > { %850 = vmatprep.subr.msk.bf16.mxu0 %vm1164_vm6, %v848_v46  ;;  %898 = vmatprep.subr.msk.bf16.mxu1 %vm1164_vm6, %v848_v46 }
 0x116   : > { %v351_v52 = vsel %vm347_vm7, %v953_v50, %v948_v48  ;;  %v350_v53 = vsel %vm347_vm7, %v952_v51, %v947_v49  ;;  %853 = vmatpush1.bf16.msk.msra.mxu0 %vm852_vm8, %v851_v47  ;;  %907 = vmatpush1.bf16.msk.msra.mxu1 %vm852_vm8, %v851_v47  ;;  %v348_v54 = vsel %vm347_vm7, %v947_v49, %v952_v51  ;;  %vm460_vm8 = vcmp.lt.s32.totalorder %v1136_v24, 112 }
 0x117   : > { %v961_v57 = vpop.permute.xlu1 %960  ;;  %v349_v58 = vsel %vm347_vm7, %v948_v48, %v953_v50  ;;  %v856_v61 = vpack.c.bf16 %v351_v52, %v350_v53  ;;  %v976_v1 = vpop.permute.xlu0 %975  ;;  %vm441_vm7 = vcmp.lt.s32.totalorder %v1139_v25, 240 }
 0x118   : > { %v963_v62 = vunpack.i.h.bf16 %v961_v57  ;;  %v962_v63 = vunpack.i.l.bf16 %v961_v57  ;;  %v854_v2 = vpack.c.bf16 %v349_v58, %v348_v54  ;;  %v978_v32 = vunpack.i.h.bf16 %v976_v1 }
 0x119   : > { %v977_v34 = vunpack.i.l.bf16 %v976_v1 }
 0x11a   : > { %v370_v4 = vsel %vm368_vm10, %v958_v56, %v963_v62  ;;  %v372_v5 = vsel %vm368_vm10, %v963_v62, %v958_v56  ;;  %v369_v6 = vsel %vm368_vm10, %v957_v60, %v962_v63  ;;  %v371_v7 = vsel %vm368_vm10, %v962_v63, %v957_v60  ;;  %855 = vmatprep.subr.bf16.mxu0 %v854_v2 }
 0x11b   : > { %v859_v10 = vpack.c.bf16 %v370_v4, %v369_v6  ;;  %899 = vmatprep.subr.bf16.mxu1 %v854_v2  ;;  %v971_v11 = vpop.permute.xlu1 %970  ;;  %v862_v13 = vpack.c.bf16 %v372_v5, %v371_v7  ;;  %858 = vmatpush1.bf16.msk.msra.mxu0 %vm1196_vm12, %v856_v61  ;;  %v986_v22 = vpop.permute.xlu0 %985 }
 0x11c   : > { %908 = vmatpush1.bf16.msk.msra.mxu1 %vm1196_vm12, %v856_v61  ;;  %v973_v14 = vunpack.i.h.bf16 %v971_v11  ;;  %v972_v17 = vunpack.i.l.bf16 %v971_v11  ;;  %v988_v40 = vunpack.i.h.bf16 %v986_v22  ;;  %v987_v41 = vunpack.i.l.bf16 %v986_v22  ;;  %vm888_vm12 = vmpackc.low %vm441_vm7, %vm441_vm7  ;;  %v499_v11 = vld [vmem:[%s1411_s2 + $0x18] sm:$0xff] }
 0x11d   : > { %861 = vmatprep.subr.msk.bf16.mxu0 %vm1203_vm13, %v859_v10  ;;  %900 = vmatprep.subr.msk.bf16.mxu1 %vm1203_vm13, %v859_v10  ;;  %v496_v10 = vld [vmem:[%s1411_s2] sm:$0xff] }
 0x11e   : > { %v395_v18 = vsel %vm393_vm15, %v968_v9, %v973_v14  ;;  %v397_v19 = vsel %vm393_vm15, %v973_v14, %v968_v9  ;;  %v394_v20 = vsel %vm393_vm15, %v967_v12, %v972_v17  ;;  %v396_v21 = vsel %vm393_vm15, %v972_v17, %v967_v12  ;;  %v503_v12 = vld [vmem:[%s1411_s2 + $0x38] sm:$0xff]  ;;  %v502_v14 = vld [vmem:[%s1411_s2 + $0x30] sm:$0xff] }
 0x11f   : > { %v865_v23 = vpack.c.bf16 %v395_v18, %v394_v20  ;;  %v981_v26 = vpop.permute.xlu1 %980  ;;  %v868_v27 = vpack.c.bf16 %v397_v19, %v396_v21  ;;  %864 = vmatpush1.bf16.msk.msra.mxu0 %vm863_vm1, %v862_v13  ;;  %v996_v39 = vpop.permute.xlu0 %995 }
 0x120   : > { %909 = vmatpush1.bf16.msk.msra.mxu1 %vm863_vm1, %v862_v13  ;;  %v983_v28 = vunpack.i.h.bf16 %v981_v26  ;;  %v982_v29 = vunpack.i.l.bf16 %v981_v26  ;;  %v998_v50 = vunpack.i.h.bf16 %v996_v39  ;;  %v997_v51 = vunpack.i.l.bf16 %v996_v39  ;;  %v498_v13 = vld [vmem:[%s1411_s2 + $0x10] sm:$0xff] }
 0x121   : > { %867 = vmatprep.subr.msk.bf16.mxu0 %vm1164_vm6, %v865_v23  ;;  %901 = vmatprep.subr.msk.bf16.mxu1 %vm1164_vm6, %v865_v23  ;;  %vm1259_vm6 = vmand %vm441_vm7, %vm1149_vm4 }
 0x122   : > { %v418_v36 = vsel %vm414_vm3, %v983_v28, %v978_v32  ;;  %v417_v37 = vsel %vm414_vm3, %v982_v29, %v977_v34  ;;  %v416_v42 = vsel %vm414_vm3, %v978_v32, %v983_v28  ;;  %v415_v43 = vsel %vm414_vm3, %v977_v34, %v982_v29  ;;  %vm1277_vm4 = vmpackc.low %vm1189_vm11, %vm1189_vm11 }
 0x123   : > { %v991_v35 = vpop.permute.xlu1 %990  ;;  %870 = vmatpush1.bf16.msk.msra.mxu0 %vm1235_vm5, %v868_v27  ;;  %v875_v44 = vpack.c.bf16 %v418_v36, %v417_v37  ;;  %vm882_vm10 = vmpackc.low %vm1259_vm6, %vm1259_vm6  ;;  %v1006_v52 = vpop.permute.xlu0 %1005  ;;  %vm481_vm11 = vcmp.lt.s32.totalorder %v1136_v24, 111  ;;  %v500_v24 = vld [vmem:[%s1411_s2 + $0x20] sm:$0xff] }
 0x124   : > { %910 = vmatpush1.bf16.msk.msra.mxu1 %vm1235_vm5, %v868_v27  ;;  %v993_v30 = vunpack.i.h.bf16 %v991_v35  ;;  %v992_v38 = vunpack.i.l.bf16 %v991_v35  ;;  %872 = vmatprep.subr.bf16.mxu0 %v1112_v15  ;;  %v1008_v62 = vunpack.i.h.bf16 %v1006_v52  ;;  %v1007_v63 = vunpack.i.l.bf16 %v1006_v52 }
 0x125   : > { %902 = vmatprep.subr.bf16.mxu1 %v1112_v15 }
 0x126   : > { %v439_v15 = vsel %vm435_vm2, %v993_v30, %v988_v40  ;;  %v438_v47 = vsel %vm435_vm2, %v992_v38, %v987_v41  ;;  %v437_v53 = vsel %vm435_vm2, %v988_v40, %v993_v30  ;;  %v436_v54 = vsel %vm435_vm2, %v987_v41, %v992_v38 }
 0x127   : > { %v1001_v45 = vpop.permute.xlu1 %1000  ;;  %874 = vmatpush1.bf16.msra.mxu0 %v1114_v16  ;;  %v881_v56 = vpack.c.bf16 %v439_v15, %v438_v47  ;;  %v884_v0 = vpack.c.bf16 %v437_v53, %v436_v54 }
 0x128   : > { %911 = vmatpush1.bf16.msra.mxu1 %v1114_v16  ;;  %v1003_v48 = vunpack.i.h.bf16 %v1001_v45  ;;  %v1002_v49 = vunpack.i.l.bf16 %v1001_v45  ;;  %877 = vmatprep.subr.msk.bf16.mxu0 %vm1203_vm13, %v875_v44  ;;  %v878_v16 = vpack.c.bf16 %v416_v42, %v415_v43 }
 0x129   : > { %903 = vmatprep.subr.msk.bf16.mxu1 %vm1203_vm13, %v875_v44  ;;  %vm1308_vm13 = vmand %vm441_vm7, %vm1182_vm9 }
 0x12a   : > { %v464_v58 = vsel %vm460_vm8, %v1003_v48, %v998_v50  ;;  %v463_v59 = vsel %vm460_vm8, %v1002_v49, %v997_v51  ;;  %v461_v2 = vsel %vm460_vm8, %v997_v51, %v1002_v49  ;;  %v462_v3 = vsel %vm460_vm8, %v998_v50, %v1003_v48  ;;  %vm893_vm9 = vmpackc.low %vm1308_vm13, %vm1308_vm13 }
 0x12b   : > { %v1011_v57 = vpop.permute.xlu1 %1010  ;;  %880 = vmatpush1.bf16.msk.msra.mxu0 %vm1277_vm4, %v878_v16  ;;  %v887_v1 = vpack.c.bf16 %v464_v58, %v463_v59  ;;  %v890_v55 = vpack.c.bf16 %v462_v3, %v461_v2  ;;  %v690_v2 = vld [vmem:[%s1376_s15 + $0x20] sm:$0xff] }
 0x12c   : > { %912 = vmatpush1.bf16.msk.msra.mxu1 %vm1277_vm4, %v878_v16  ;;  %v1013_v60 = vunpack.i.h.bf16 %v1011_v57  ;;  %v1012_v61 = vunpack.i.l.bf16 %v1011_v57  ;;  %883 = vmatprep.subr.msk.bf16.mxu0 %vm882_vm10, %v881_v56 }
 0x12d   : > { %904 = vmatprep.subr.msk.bf16.mxu1 %vm882_vm10, %v881_v56 }
 0x12e   : > { %v485_v5 = vsel %vm481_vm11, %v1013_v60, %v1008_v62  ;;  %v484_v6 = vsel %vm481_vm11, %v1012_v61, %v1007_v63  ;;  %v483_v25 = vsel %vm481_vm11, %v1008_v62, %v1013_v60  ;;  %v482_v7 = vsel %vm481_vm11, %v1007_v63, %v1012_v61  ;;  %v686_v63 = vld [vmem:[%s1376_s15] sm:$0xff] }
 0x12f   : > { %886 = vmatpush1.bf16.msk.msra.mxu0 %vm1235_vm5, %v884_v0  ;;  %v892_v8 = vpack.c.bf16 %v485_v5, %v484_v6  ;;  %v895_v9 = vpack.c.bf16 %v483_v25, %v482_v7  ;;  %v687_v5 = vld [vmem:[%s1376_s15 + $0x8] sm:$0xff] }
 0x130   : > { %913 = vmatpush1.bf16.msk.msra.mxu1 %vm1235_vm5, %v884_v0  ;;  %889 = vmatprep.subr.msk.bf16.mxu0 %vm888_vm12, %v887_v1  ;;  %v691_v7 = vld [vmem:[%s1376_s15 + $0x28] sm:$0xff] }
 0x131   : > { %905 = vmatprep.subr.msk.bf16.mxu1 %vm888_vm12, %v887_v1 }
 0x133   : > { %891 = vmatpush1.bf16.msra.mxu0 %v890_v55 }
 0x134   : > { %914 = vmatpush1.bf16.msra.mxu1 %v890_v55  ;;  %894 = vmatprep.subr.msk.bf16.mxu0 %vm893_vm9, %v892_v8  ;;  %v511_v17 = vpop.permute.xlu0 %510 }
 0x135   : > { %906 = vmatprep.subr.msk.bf16.mxu1 %vm893_vm9, %v892_v8 }
 0x137   : > { %897 = vmatpush1.bf16.msk.msra.mxu0 %vm1277_vm4, %v895_v9 }
 0x138   : > { %915 = vmatpush1.bf16.msk.msra.mxu1 %vm1277_vm4, %v895_v9  ;;  %v521_v19 = vpop.permute.xlu0 %520 }
 0x13a   : > { %606 = vmatmul.mubr.f32.vlgmr.msra.gmra.mrb[0].mxu0 %v496_v10 }
 0x13b   : > { %618 = vmatmul.mubr.f32.vlgmr.msra.gmra.mrb[0].mxu1 %v500_v24  ;;  %831 = vmatprep.mubr.msk.f32.mxu0 %vm528_vm0, %v499_v11  ;;  %v688_v24 = vld [vmem:[%s1376_s15 + $0x10] sm:$0xff] }
 0x13c   : > { %833 = vmatprep.mubr.msk.f32.mxu1 %vm528_vm0, %v503_v12  ;;  %v516_v18 = vpop.permute.xlu1 %515 }
 0x13e   : > { %612 = vmatmul.mubr.f32.gmra.mrb[2].mxu0 %v498_v13 }
 0x13f   : > { %624 = vmatmul.mubr.f32.gmra.mrb[2].mxu1 %v502_v14  ;;  %v692_v14 = vld [vmem:[%s1376_s15 + $0x30] sm:$0xff] }
 0x140   : > { %v526_v34 = vpop.permute.xlu1 %525 }
 0x20d   : > { %v607_v20 = vpop.f32.mrb[0].mxu0 }
 0x20e   : > { %v619_v21 = vpop.f32.mrb[0].mxu1  ;;  %v608_v22 = vadd.f32 %v607_v20, %v511_v17  ;;  %v609_v26 = vpop.f32.mrb[1].mxu0  ;;  %v689_v20 = vld [vmem:[%s1376_s15 + $0x18] sm:$0xff] }
 0x20f   : > { %v1351_v23 = vadd.f32 %v619_v21, %v521_v19  ;;  %v621_v27 = vpop.f32.mrb[1].mxu1  ;;  %v1353_v28 = vadd.f32 %v609_v26, %v511_v17  ;;  %v693_v26 = vld [vmem:[%s1376_s15 + $0x38] sm:$0xff] }
 0x210   : > { %v1355_v29 = vadd.f32 %v621_v27, %v521_v19  ;;  %v834_v31 = vmul.f32 -1.442695, %v608_v22 }
 0x211   : > { %v838_v32 = vmul.f32 -1.442695, %v1351_v23  ;;  %v835_v35 = vmul.f32 -1.442695, %v1353_v28  ;;  %v613_v37 = vpop.f32.mrb[2].mxu0 }
 0x212   : > { %v839_v36 = vmul.f32 -1.442695, %v1355_v29  ;;  %v625_v30 = vpop.f32.mrb[2].mxu1  ;;  %1015 = vpow2.f32 %v834_v31  ;;  %v1360_v38 = vadd.f32 %v613_v37, %v516_v18  ;;  %v615_v40 = vpop.f32.mrb[3].mxu0 }
 0x213   : > { %v1362_v39 = vadd.f32 %v625_v30, %v526_v34  ;;  %v627_v41 = vpop.f32.mrb[3].mxu1  ;;  %1017 = vpow2.f32 %v838_v32  ;;  %v1364_v42 = vadd.f32 %v615_v40, %v516_v18 }
 0x214   : > { %v1366_v43 = vadd.f32 %v627_v41, %v526_v34  ;;  %1019 = vpow2.f32 %v835_v35  ;;  %v836_v44 = vmul.f32 -1.442695, %v1360_v38 }
 0x215   : > { %v840_v45 = vmul.f32 -1.442695, %v1362_v39  ;;  %1021 = vpow2.f32 %v839_v36  ;;  %v837_v46 = vmul.f32 -1.442695, %v1364_v42 }
 0x216   : > { %v841_v15 = vmul.f32 -1.442695, %v1366_v43  ;;  %1023 = vpow2.f32 %v836_v44 }
 0x217   : > { %1025 = vpow2.f32 %v840_v45 }
 0x218   : > { %1027 = vpow2.f32 %v837_v46 }
 0x219   : > { %1029 = vpow2.f32 %v841_v15 }
 0x21c   : > { %v1016_v47 = vpop.eup %1015 }
 0x21d   : > { %v1018_v48 = vpop.eup %1017  ;;  %v654_v49 = vadd.f32 1.0, %v1016_v47 }
 0x21e   : > { %v1020_v33 = vpop.eup %1019  ;;  %v658_v50 = vadd.f32 1.0, %v1018_v48 }
 0x21f   : > { %v1022_v51 = vpop.eup %1021  ;;  %1031 = vrcp.f32 %v654_v49  ;;  %v655_v16 = vadd.f32 1.0, %v1020_v33 }
 0x220   : > { %v1024_v52 = vpop.eup %1023  ;;  %1033 = vrcp.f32 %v658_v50  ;;  %v659_v53 = vadd.f32 1.0, %v1022_v51 }
 0x221   : > { %v1026_v54 = vpop.eup %1025  ;;  %1035 = vrcp.f32 %v655_v16  ;;  %v656_v56 = vadd.f32 1.0, %v1024_v52 }
 0x222   : > { %v1028_v57 = vpop.eup %1027  ;;  %1037 = vrcp.f32 %v659_v53  ;;  %v660_v58 = vadd.f32 1.0, %v1026_v54 }
 0x223   : > { %v1030_v59 = vpop.eup %1029  ;;  %1039 = vrcp.f32 %v656_v56  ;;  %v657_v60 = vadd.f32 1.0, %v1028_v57 }
 0x224   : > { %1041 = vrcp.f32 %v660_v58  ;;  %v661_v61 = vadd.f32 1.0, %v1030_v59 }
 0x225   : > { %1043 = vrcp.f32 %v657_v60 }
 0x226   : > { %1045 = vrcp.f32 %v661_v61 }
 0x229   : > { %v1032_v62 = vpop.eup %1031 }
 0x22a   : > { %v1034_v0 = vpop.eup %1033  ;;  %v678_v1 = vmul.f32 %v1032_v62, %v608_v22 }
 0x22b   : > { %v1036_v3 = vpop.eup %1035  ;;  %v682_v4 = vmul.f32 %v1034_v0, %v1351_v23 }
 0x22c   : > { %v1038_v6 = vpop.eup %1037  ;;  %v694_v55 = vadd.f32 %v686_v63, %v678_v1  ;;  %v679_v25 = vmul.f32 %v1036_v3, %v1353_v28 }
 0x22d   : > { %v1040_v8 = vpop.eup %1039  ;;  %v698_v9 = vadd.f32 %v690_v2, %v682_v4  ;;  %v683_v10 = vmul.f32 %v1038_v6, %v1355_v29 }
 0x22e   : > { %v1042_v11 = vpop.eup %1041  ;;  %702 = vst [vmem:[%s1383_s17] sm:$0xff] %v694_v55  ;;  %v695_v12 = vadd.f32 %v687_v5, %v679_v25  ;;  %v680_v13 = vmul.f32 %v1040_v8, %v1360_v38 }
 0x22f   : > { %v1044_v17 = vpop.eup %1043  ;;  %706 = vst [vmem:[%s1383_s17 + $0x20] sm:$0xff] %v698_v9  ;;  %v699_v18 = vadd.f32 %v691_v7, %v683_v10  ;;  %v684_v19 = vmul.f32 %v1042_v11, %v1362_v39 }
 0x230   : > { %v1046_v21 = vpop.eup %1045  ;;  %703 = vst [vmem:[%s1383_s17 + $0x8] sm:$0xff] %v695_v12  ;;  %v696_v22 = vadd.f32 %v688_v24, %v680_v13  ;;  %v681_v23 = vmul.f32 %v1044_v17, %v1364_v42 }
 0x231   : > { %707 = vst [vmem:[%s1383_s17 + $0x28] sm:$0xff] %v699_v18  ;;  %v700_v27 = vadd.f32 %v692_v14, %v684_v19  ;;  %v685_v28 = vmul.f32 %v1046_v21, %v1366_v43 }
 0x232   : > { %704 = vst [vmem:[%s1383_s17 + $0x10] sm:$0xff] %v696_v22  ;;  %v697_v29 = vadd.f32 %v689_v20, %v681_v23 }
 0x233   : > { %708 = vst [vmem:[%s1383_s17 + $0x30] sm:$0xff] %v700_v27  ;;  %v701_v31 = vadd.f32 %v693_v26, %v685_v28 }
 0x234   : > { %705 = vst [vmem:[%s1383_s17 + $0x18] sm:$0xff] %v697_v29 }
 0x235   : > { %709 = vst [vmem:[%s1383_s17 + $0x38] sm:$0xff] %v701_v31 }
 0x236 PF: > { %s15_s18 = sadd.s32 1, %s1053_s18  }
 0x237   : > { %p12_p4 = scmp.ge.s32.totalorder %s15_s18, 4  }
 0x239   :  { %14 = sbr.rel (!%p12_p4) target bundleno = 1 (0x1), region = 76 }

// kernel: bottleneck_pallas.2
= control target key start
LH: loop header
LB: loop body
LE: loop exit
PB: predicated region body
PF: predicated region fallthrough
CT: control target
= control target key end

     0   :  { %s656_s15 = smov 0   ;;  %s658_s16 = smov 0   ;;  %s721_s0 = inlined_call_operand.vmem [shape: f32[2,32,256], index: 0, kind: input, shape index: {}]   ;;  %s722_s1 = inlined_call_operand.vmem [shape: f32[16,32], index: 1, kind: input, shape index: {}]   ;;  %s723_s2 = inlined_call_operand.vmem [shape: f32[16,1], index: 2, kind: input, shape index: {}]   ;;  %s724_s3 = inlined_call_operand.vmem [shape: f32[2,16,256], index: 3, kind: output, shape index: {0}]   ;;  %s725_s4 = inlined_call_operand.vmem [shape: f32[2,16,1], index: 4, kind: output, shape index: {1}]  }
   0x1   :  { %s660_s17 = smov 0  }
   0x2 LB: > { %s27_s18 = sadd.s32 1, %s623_s16  ;;  %p532_p0 = scmp.ge.s32.totalorder %s627_s17, 1  ;;  %s627_s17 = sphi %s660_s17, %s15_s17   ;;  %s623_s16 = sphi %s658_s16, %s727_s16   ;;  %s619_s15 = sphi %s656_s15, %s726_s15  }
   0x3   : > { %p29_p1 = scmp.ge.s32.totalorder %s27_s18, 2  ;;  %p186_p2 = scmp.lt.s32.totalorder %s627_s17, 3 }
   0x5   : > { %s729_s18 = smov (%p29_p1, %s27_s18), 0  ;;  %p187_p3 = pnand %p532_p0, %p186_p2 }
   0x6   : > { %p226_p4 = scmp.lt.s32.totalorder (!%p187_p3), %s619_s15, 1  ;;  %v629_v0 = vmov (!%p187_p3), 0.0   ;;  %v260_v1 = vld [vmem:[%s723_s2] sm:$0xff] (!%p187_p3)  ;;  %v630_v2 = vmov (!%p187_p3), 0   ;;  %vm392_vm0 = vcmask (!%p187_p3), 7168   ;;  %v261_v3 = vld [vmem:[%s723_s2 + $0x8] sm:$0xff] (!%p187_p3) }
   0x7   : > { %190 = sbr.rel (%p187_p3) target bundleno = 423 (0x1a7), region = 32  ;;  %343 = vmatprep.mubr.f32.mxu0 (!%p187_p3), %v629_v0  ;;  %349 = vmatprep.mubr.f32.mxu1 (!%p187_p3), %v629_v0  ;;  %v258_v16 = vld [vmem:[%s722_s1] sm:$0xff] (!%p187_p3)  ;;  %vm272_vm1 = vcmask (!%p187_p3), 261120   ;;  %v259_v17 = vld [vmem:[%s722_s1 + $0x8] sm:$0xff] (!%p187_p3) }
   0x8   : > { %588 = vset.pattern.permute.xlu0 (!%p187_p3), %v630_v2 }
   0x9   : > { %264 = vperm.xlu0 (!%p187_p3), %588, %v260_v1  }
   0xd   : > { %269 = vperm.xlu0 (!%p187_p3), %588, %v261_v3  }
   0xe   : > { %s731_s15 = smov (!%p226_p4, %s619_s15), 1 }
   0xf   : > { %s547_s21 = sshll.u32 %s731_s15, 6  ;;  %s549_s22 = sshll.u32 %s731_s15, 4 }
  0x10   : > { %s233_s27 = scalar_lea.vmem %s721_s0, %s547_s21  ;;  %s690_s30 = scalar_lea.vmem %s725_s4, %s549_s22 }
  0x11   : > { %v251_v4 = vld [vmem:[%s233_s27 + $0x8] sm:$0xff]  ;;  %v253_v5 = vld [vmem:[%s233_s27 + $0x18] sm:$0xff]  ;;  %v250_v6 = vld [vmem:[%s233_s27] sm:$0xff]  ;;  %393 = vst.msk [vmem:[%s690_s30] sm:$0xff] %vm392_vm0, %v629_v0  ;;  %s548_s9 = sshll.u32 %s731_s15, 5 }
  0x12   : > { %394 = vst.msk [vmem:[%s690_s30 + $0x8] sm:$0xff] %vm392_vm0, %v629_v0  ;;  %v550_v7 = vpack.c.bf16 %v253_v5, %v251_v4  ;;  %v252_v8 = vld [vmem:[%s233_s27 + $0x10] sm:$0xff]  ;;  %v255_v9 = vld [vmem:[%s233_s27 + $0x28] sm:$0xff]  ;;  %v257_v10 = vld [vmem:[%s233_s27 + $0x38] sm:$0xff]  ;;  %s243_s12 = scalar_lea.vmem %s724_s3, %s548_s9 }
  0x13   : > { %v552_v11 = vpack.c.bf16 %v252_v8, %v250_v6  ;;  %v554_v12 = vpack.c.bf16 %v257_v10, %v255_v9  ;;  %v254_v13 = vld [vmem:[%s233_s27 + $0x20] sm:$0xff]  ;;  %v256_v14 = vld [vmem:[%s233_s27 + $0x30] sm:$0xff] }
  0x14   : > { %551 = vmatprep.subr.bf16.mxu0 %v550_v7  ;;  %558 = vmatprep.subr.bf16.mxu1 %v550_v7  ;;  %v556_v15 = vpack.c.bf16 %v256_v14, %v254_v13 }
  0x15   : > { %553 = vmatpush1.bf16.msra.mxu0 %v552_v11  ;;  %560 = vmatpush1.bf16.msra.mxu1 %v552_v11 }
  0x16   : > { %555 = vmatprep.subr.bf16.mxu0 %v554_v12  ;;  %559 = vmatprep.subr.bf16.mxu1 %v554_v12 }
  0x18   : > { %v395_v50 = vld [vmem:[%s690_s30] sm:$0xff] }
  0x19   : > { %557 = vmatpush1.bf16.msra.mxu0 %v556_v15  ;;  %561 = vmatpush1.bf16.msra.mxu1 %v556_v15  ;;  %v396_v53 = vld [vmem:[%s690_s30 + $0x8] sm:$0xff] }
  0x1c   : > { %539 = vmatmul.mubr.msk.f32.vlgmr.msra.gmra.mrb[0].mxu0 %vm272_vm1, %v258_v16  ;;  %540 = vmatmul.mubr.msk.f32.vlgmr.msra.gmra.mrb[0].mxu1 %vm272_vm1, %v259_v17 }
  0x88   : > { %v265_v18 = vpop.permute.xlu0 %264 }
  0x8c   : > { %v270_v19 = vpop.permute.xlu0 %269 }
  0xef   : > { %v345_v20 = vpop.f32.mrb[0].mxu0  ;;  %v351_v21 = vpop.f32.mrb[0].mxu1 }
  0xf0   : > { %v346_v22 = vadd.f32 %v345_v20, %v265_v18  ;;  %v352_v23 = vadd.f32 %v351_v21, %v270_v19  ;;  %v347_v24 = vpop.f32.mrb[1].mxu0  ;;  %v353_v25 = vpop.f32.mrb[1].mxu1 }
  0xf1   : > { %v348_v26 = vadd.f32 %v347_v24, %v265_v18  ;;  %v354_v27 = vadd.f32 %v353_v25, %v270_v19 }
  0xf2   : > { %v541_v28 = vmul.f32 -1.442695, %v346_v22  ;;  %v543_v29 = vmul.f32 -1.442695, %v352_v23 }
  0xf3   : > { %v542_v30 = vmul.f32 -1.442695, %v348_v26  ;;  %v544_v31 = vmul.f32 -1.442695, %v354_v27 }
  0xf4   : > { %589 = vpow2.f32 %v541_v28 }
  0xf5   : > { %591 = vpow2.f32 %v543_v29 }
  0xf6   : > { %593 = vpow2.f32 %v542_v30 }
  0xf7   : > { %595 = vpow2.f32 %v544_v31 }
  0xfe   : > { %v590_v32 = vpop.eup %589 }
  0xff   : > { %v592_v33 = vpop.eup %591  ;;  %v368_v34 = vadd.f32 1.0, %v590_v32 }
 0x100   : > { %v594_v35 = vpop.eup %593  ;;  %v370_v36 = vadd.f32 1.0, %v592_v33 }
 0x101   : > { %v596_v37 = vpop.eup %595  ;;  %597 = vrcp.f32 %v368_v34  ;;  %v369_v38 = vadd.f32 1.0, %v594_v35 }
 0x102   : > { %599 = vrcp.f32 %v370_v36  ;;  %v371_v39 = vadd.f32 1.0, %v596_v37 }
 0x103   : > { %601 = vrcp.f32 %v369_v38 }
 0x104   : > { %603 = vrcp.f32 %v371_v39 }
 0x10b   : > { %v598_v40 = vpop.eup %597 }
 0x10c   : > { %v600_v41 = vpop.eup %599  ;;  %v380_v42 = vmul.f32 %v598_v40, %v346_v22 }
 0x10d   : > { %v602_v43 = vpop.eup %601  ;;  %v382_v44 = vmul.f32 %v600_v41, %v352_v23 }
 0x10e   : > { %v604_v45 = vpop.eup %603  ;;  %v381_v46 = vmul.f32 %v602_v43, %v348_v26  ;;  %384 = vst [vmem:[%s243_s12] sm:$0xff] %v380_v42 }
 0x10f   : > { %386 = vst [vmem:[%s243_s12 + $0x10] sm:$0xff] %v382_v44  ;;  %v383_v47 = vmul.f32 %v604_v45, %v354_v27 }
 0x110   : > { %385 = vst [vmem:[%s243_s12 + $0x8] sm:$0xff] %v381_v46  ;;  %v397_v48 = vadd.f32 %v381_v46, %v380_v42 }
 0x111   : > { %387 = vst [vmem:[%s243_s12 + $0x18] sm:$0xff] %v383_v47  ;;  %v400_v49 = vadd.f32 %v383_v47, %v382_v44 }
 0x112   : > { %398 = vadd.xlane.f32.xlu1 %v397_v48 }
 0x116   : > { %401 = vadd.xlane.f32.xlu1 %v400_v49 }
 0x19f   : > { %v399_v51 = vpop.xlane.xlu1 %398 }
 0x1a0   : > { %v403_v52 = vadd.f32 %v399_v51, %v395_v50 }
 0x1a2   : > { %406 = vst.msk [vmem:[%s690_s30] sm:$0xff] %vm392_vm0, %v403_v52 }
 0x1a3   : > { %v402_v54 = vpop.xlane.xlu1 %401 }
 0x1a4   : > { %v404_v55 = vadd.f32 %v402_v54, %v396_v53 }
 0x1a6   : > { %407 = vst.msk [vmem:[%s690_s30 + $0x8] sm:$0xff] %vm392_vm0, %v404_v55 }
 0x1a7 PF: > { %s15_s17 = sadd.s32 1, %s627_s17   ;;  %s726_s15 = smov %s623_s16 }
 0x1a8   : > { %p12_p5 = scmp.ge.s32.totalorder %s15_s17, 4   ;;  %s727_s16 = smov %s729_s18 }
 0x1aa   :  { %14 = sbr.rel (!%p12_p5) target bundleno = 2 (0x2), region = 78 }

</bundles_post_ra>
